<compile_context>
chip_gen: v6e
topology: v6e:2x2x1
jax: 0.10.0
libtpu: 0.0.40
codegen_flags: <defaults>
</compile_context>

<pallas_src>
import jax
import jax.numpy as jnp
from jax.experimental import pallas as pl
from jax.experimental.pallas import tpu as pltpu


def _cube_kernel(x_ref, o_ref):
    x = x_ref[...]
    o_ref[...] = x * x * x  # x**3 on the VPU, in the source dtype (matches torch.pow(x, 3))


def _chip_config():
    """Returns (target_tile_bytes, vmem_limit_bytes_or_None, is_v7)."""
    kind = ""
    try:
        kind = jax.devices()[0].device_kind.lower()
    except Exception:  # pragma: no cover - be conservative if query fails
        pass
    if "v7" in kind:
        # ~3.2 TB/s HBM: 6 MiB tiles keep the fixed step overhead <10%.
        # 4 buffers (in+out, double-buffered) = 24 MiB; raise scoped VMEM to 40 MiB
        # (64 MiB physical) for compiler-scratch headroom.
        return 6 * 1024 * 1024, 40 * 1024 * 1024, True
    if "v6" in kind:
        # ~1.4 TB/s: 4 MiB tiles; 16 MiB total, well under the 32 MiB scoped default.
        return 4 * 1024 * 1024, None, False
    # v5e and anything unknown: 2 MiB tiles; 8 MiB total < 16 MiB scoped default.
    return 2 * 1024 * 1024, None, False


def cube_activation(x: jax.Array, *, donate_input: bool = False) -> jax.Array:
    """Elementwise cube, matching torch.pow(x, 3) semantics (shape/dtype preserved)."""
    orig_shape = x.shape
    dtype = x.dtype
    n = x.size
    if n == 0:
        return x
    itemsize = jnp.dtype(dtype).itemsize
    # Native sublane packing multiple: 8 for 32-bit, 16 for 16-bit, 32 for 8-bit dtypes.
    sublane_mult = max(8, 32 // itemsize)

    x_flat = x.reshape(-1)

    # Widest lane-dense layout that divides n exactly (no padding needed); otherwise a
    # 128-lane body plus a tiny (<128 element) jnp tail.
    lanes = None
    for cand in (1024, 512, 256, 128):
        if n % cand == 0:
            lanes = cand
            break
    if lanes is None:
        lanes = 128
    body_n = (n // lanes) * lanes
    tail_n = n - body_n

    if body_n == 0:
        # Fewer than 128 elements: a kernel launch is pure overhead.
        return (x_flat * x_flat * x_flat).reshape(orig_shape)

    x_body = x_flat[:body_n] if tail_n else x_flat
    rows = body_n // lanes
    x2d = x_body.reshape(rows, lanes)

    target_tile_bytes, vmem_limit, is_v7 = _chip_config()
    row_bytes = lanes * itemsize
    tile_rows = max(
        sublane_mult,
        (target_tile_bytes // row_bytes) // sublane_mult * sublane_mult,
    )
    tile_rows = min(tile_rows, rows)

    if is_v7 and body_n * itemsize > (1 << 20) and rows >= 2 * sublane_mult:
        # Keep both TensorCores busy: force at least 2 grid steps for >~1 MiB of data.
        half_rows = pl.cdiv(pl.cdiv(rows, 2), sublane_mult) * sublane_mult
        tile_rows = min(tile_rows, half_rows)
    num_steps = pl.cdiv(rows, tile_rows)
    if is_v7 and num_steps > 1 and num_steps % 2 == 1:
        # Prefer an even step count so the two cores get balanced work.
        cand_rows = max(
            sublane_mult,
            pl.cdiv(pl.cdiv(rows, num_steps + 1), sublane_mult) * sublane_mult,
        )
        if pl.cdiv(rows, cand_rows) % 2 == 0:
            tile_rows = cand_rows
            num_steps = pl.cdiv(rows, cand_rows)
    grid = (num_steps,)

    compiler_kwargs = dict(dimension_semantics=(pltpu.PARALLEL,))
    if vmem_limit is not None:
        compiler_kwargs["vmem_limit_bytes"] = vmem_limit

    call_kwargs = {}
    if donate_input and tail_n == 0:
        # Lets XLA reuse x's buffer for the output when the caller donates x.
        call_kwargs["input_output_aliases"] = {0: 0}

    # TODO(synk): optionally sweep pipeline_mode=pl.Buffered(3) on the input BlockSpec
    # on v7x once tile sizes are finalized (expected 0-5%).
    y2d = pl.pallas_call(
        _cube_kernel,
        out_shape=jax.ShapeDtypeStruct((rows, lanes), dtype),
        grid=grid,
        in_specs=[pl.BlockSpec((tile_rows, lanes), lambda i: (i, 0))],
        out_specs=pl.BlockSpec((tile_rows, lanes), lambda i: (i, 0)),
        compiler_params=pltpu.CompilerParams(**compiler_kwargs),
        cost_estimate=pl.CostEstimate(
            flops=2 * body_n,
            transcendentals=0,
            bytes_accessed=2 * body_n * itemsize,
        ),
        **call_kwargs,
    )(x2d)

    y_body = y2d.reshape(-1)
    if tail_n:
        x_tail = x_flat[body_n:]
        y_flat = jnp.concatenate([y_body, x_tail * x_tail * x_tail])
    else:
        y_flat = y_body
    return y_flat.reshape(orig_shape)


if __name__ == "__main__":
    key = jax.random.PRNGKey(0)
    # NCHW input, consistent with the (conv-style) parsing model usage.
    x = jax.random.normal(key, (2, 4, 16, 16), dtype=jnp.float32)

    y = cube_activation(x)
    jax.block_until_ready(y)

    y_ref = x ** 3
    assert y.shape == x.shape and y.dtype == x.dtype
    assert jnp.allclose(y, y_ref, atol=1e-6, rtol=1e-6)
    print("KERNEL_OK")
</pallas_src>

<mosaic_0001>
module attributes {stable_mosaic.version = 11 : i64} {
  func.func @_cube_kernel(%arg0: i32, %arg1: memref<2x1024xf32, #tpu.memory_space<vmem>>, %arg2: memref<2x1024xf32, #tpu.memory_space<vmem>>) attributes {dimension_semantics = [#tpu.dimension_semantics<parallel>], iteration_bounds = array<i64: 1>, scalar_prefetch = 0 : i64, scratch_operands = 0 : i64, tpu.core_type = #tpu.core_type<tc>, window_params = [{transform_indices = @transform_0, window_bounds = array<i64: 2, 1024>}, {transform_indices = @transform_1, window_bounds = array<i64: 2, 1024>}]} {
    %c0 = arith.constant 0 : index
    %c0_0 = arith.constant 0 : index
    %0 = vector.load %arg1[%c0, %c0_0] : memref<2x1024xf32, #tpu.memory_space<vmem>>, vector<2x1024xf32>
    %1 = arith.mulf %0, %0 : vector<2x1024xf32>
    %2 = arith.mulf %1, %0 : vector<2x1024xf32>
    %c0_1 = arith.constant 0 : index
    %c0_2 = arith.constant 0 : index
    %3 = vector.load %arg2[%c0_1, %c0_2] : memref<2x1024xf32, #tpu.memory_space<vmem>>, vector<2x1024xf32>
    tpu.vector_store %arg2[%c0_1, %c0_2], %2 {strides = array<i32>} : memref<2x1024xf32, #tpu.memory_space<vmem>>, vector<2x1024xf32>,
    return
  }
  func.func @transform_0(%arg0: i32) -> (i32, i32) {
    %c0_i32 = arith.constant 0 : i32
    %c0_i32_0 = arith.constant 0 : i32
    return %arg0, %c0_i32 : i32, i32
  }
  func.func @transform_1(%arg0: i32) -> (i32, i32) {
    %c0_i32 = arith.constant 0 : i32
    %c0_i32_0 = arith.constant 0 : i32
    return %arg0, %c0_i32 : i32, i32
  }
}

</mosaic_0001>

<bundles_post_ra>
// kernel: tpu_custom_call.1
= control target key start
LH: loop header
LB: loop body
LE: loop exit
PB: predicated region body
PF: predicated region fallthrough
CT: control target
= control target key end

     0   :  { %6 = vsyncpa [#allocation3], 0  ;;  %s108_s0 = inlined_call_operand.hbm [shape: f32[2,1024], index: 0, kind: input, shape index: {}]   ;;  %s109_s1 = inlined_call_operand.hbm [shape: f32[2,1024], index: 1, kind: output, shape index: {}]  }
   0x1   :  { %7 = vsyncpa [#allocation4], 0  ;;  %s90_s6 = smov [#allocation2]  }
   0x2   :  { %s14_s7 = sshll.u32 %s90_s6, 4  ;;  %s15_s7 = int_to_ptr.vmem [resolvable:$true] %s14_s7 }
   0x3   :  { %s54_s8 = scalar_lea.vmem %s15_s7, 256  ;;  %p59_p1 = scmp.lt.s32.totalorder %s15_s7, %s15_s7 }
   0x4   :  { %p55_p0 = scmp.ne.s32.totalorder %s15_s7, %s54_s8  ;;  %p60_p2 = scmp.lt.s32.totalorder %s54_s8, %s54_s8 }
   0x6   :  { %p61_p3 = por %p60_p2, %p59_p1 }
   0x8   :  { %p62_p4 = pnand %p61_p3, %p55_p0 }
   0xa   :  { %65 = shalt.err (!%p62_p4)
}
   0xb   :  { %17 = dma.hbm_to_vmem [thread:$0]  %s108_s0, 256, %s15_s7, [#allocation3]  }
   0xc   :  { %86 = dma.done.wait [#allocation3], 256  }
   0xd   :  { %87 = vsyncadd [#allocation3], 4294967040  ;;  %v21_v0 = vld [vmem:[#allocation2] sm:$0xff]  ;;  %v22_v1 = vld [vmem:[#allocation2 + $0x8] sm:$0xff]  ;;  %s91_s11 = smov [#allocation5]  }
   0xe   :  { %s35_s12 = sshll.u32 %s91_s11, 4  ;;  %v23_v2 = vmul.f32 %v21_v0, %v21_v0  ;;  %v24_v3 = vmul.f32 %v22_v1, %v22_v1  ;;  %s36_s12 = int_to_ptr.vmem [resolvable:$true] %s35_s12 }
   0xf   :  { %s66_s13 = scalar_lea.vmem %s36_s12, 256  ;;  %p71_p6 = scmp.lt.s32.totalorder %s36_s12, %s36_s12 }
  0x10   :  { %v25_v4 = vmul.f32 %v23_v2, %v21_v0  ;;  %v26_v5 = vmul.f32 %v24_v3, %v22_v1  ;;  %p67_p5 = scmp.ne.s32.totalorder %s36_s12, %s66_s13  ;;  %p72_p7 = scmp.lt.s32.totalorder %s66_s13, %s66_s13 }
  0x12   :  { %27 = vst [vmem:[#allocation5] sm:$0xff] %v25_v4  ;;  %28 = vst [vmem:[#allocation5 + $0x8] sm:$0xff] %v26_v5  ;;  %p73_p8 = por %p72_p7, %p71_p6 }
  0x14   :  { %p74_p9 = pnand %p73_p8, %p67_p5 }
  0x16   :  { %77 = shalt.err (!%p74_p9)
}
  0x17   :  { %38 = dma.vmem_to_hbm [thread:$0]  %s36_s12, 256, %s109_s1, [#allocation4]  }
  0x18   :  { %88 = dma.done.wait [#allocation4], 256  }
  0x19   :  { %89 = vsyncadd [#allocation4], 4294967040 }
  0x1a   :  { %42 = vsyncpa [#allocation3], 1 }
  0x1b   :  { %43 = vsyncpa [#allocation4], 1 }

</bundles_post_ra>
